<compile_context>
chip_gen: v7x
topology: tpu7x:2x2x1
jax: 0.10.0
libtpu: 0.0.40
codegen_flags: <defaults>
</compile_context>

<pallas_src>
import functools

import jax
import jax.numpy as jnp
from jax import lax
from jax.experimental import pallas as pl
from jax.experimental.pallas import tpu as pltpu


def _round_up(n, m):
    return ((n + m - 1) // m) * m


def _linear5_kernel(seed_ref, x_ref, w1_ref, w2_ref, w3_ref, w4_ref, w5_ref,
                    o_ref, *, threshold31, batch_tile):
    """Fused 5-layer MLP for one batch tile.

    x_ref          : (bt, in_f)   bf16
    w1..w5_ref     : (in, out)    bf16  (dropout scale already folded into w2..w5,
                                         w5 zero-padded to a multiple of 128 lanes)
    o_ref          : (bt, n_pad)  f32
    """
    seed = seed_ref[0].astype(jnp.uint32)
    row_base = (pl.program_id(0) * batch_tile).astype(jnp.uint32)

    def _keep(shape, salt):
        # Counter-based hash: unique counter per (global row, col, layer, seed),
        # mixed with a murmur3-style finalizer.  All integer VPU ops.
        r = lax.broadcasted_iota(jnp.int32, shape, 0).astype(jnp.uint32) + row_base
        c = lax.broadcasted_iota(jnp.int32, shape, 1).astype(jnp.uint32)
        z = r * jnp.uint32(shape[1]) + c
        z = z + seed * jnp.uint32(0x9E3779B9) + jnp.uint32(salt) * jnp.uint32(0x85EBCA6B)
        z = z ^ (z >> 16)
        z = z * jnp.uint32(0x7FEB352D)
        z = z ^ (z >> 15)
        z = z * jnp.uint32(0x846CA68B)
        z = z ^ (z >> 16)
        # compare the top 31 bits as signed int32 against an integer threshold:
        # P(keep) = 1 - p.  No float convert, no float multiply.
        return (z >> 1).astype(jnp.int32) >= threshold31

    def _hidden_layer(h_bf16, w_ref, salt):
        # bf16 x bf16 -> f32 accumulation on the MXU.
        h = jnp.dot(h_bf16, w_ref[...], preferred_element_type=jnp.float32)
        h = jnp.maximum(h, 0.0)                       # ReLU in f32
        h = jnp.where(_keep(h.shape, salt), h, 0.0)   # dropout: compare + select only
        return h.astype(jnp.bfloat16)                 # bf16 into the next MXU pass

    h = _hidden_layer(x_ref[...], w1_ref, 1)
    h = _hidden_layer(h, w2_ref, 2)
    h = _hidden_layer(h, w3_ref, 3)
    h = _hidden_layer(h, w4_ref, 4)
    # final layer: no ReLU / dropout (matches the PyTorch forward)
    o_ref[...] = jnp.dot(h, w5_ref[...],
                         preferred_element_type=jnp.float32).astype(o_ref.dtype)


def linear5_forward(x, params, seed, p=0.1):
    """x: any (B, ...) array; flattened to (B, in_feature) like torch.flatten(x, 1).

    params: (w1..w5), each stored as (in_features, out_features) float32
            (i.e. transposed relative to PyTorch's (out, in); y = x @ W_t).
    """
    if not (0.0 <= p < 1.0):
        raise ValueError("dropout p must be in [0, 1)")

    w1, w2, w3, w4, w5 = params
    B = x.shape[0]
    xf = x.reshape(B, -1)
    in_f = xf.shape[1]
    hidden = w1.shape[1]
    n_class = w5.shape[1]

    # Fold the inverted-dropout scale 1/(1-p) into the weights that consume a
    # dropped-out activation (fc2..fc5); cast everything feeding the MXU to bf16.
    scale = 1.0 / (1.0 - p)
    w1b = w1.astype(jnp.bfloat16)
    w2b = (w2 * scale).astype(jnp.bfloat16)
    w3b = (w3 * scale).astype(jnp.bfloat16)
    w4b = (w4 * scale).astype(jnp.bfloat16)

    # Zero-pad the classifier to a lane-dense (multiple-of-128) output width.
    n_pad = _round_up(n_class, 128)
    w5b = jnp.zeros((hidden, n_pad), jnp.float32).at[:, :n_class].set(
        w5 * scale).astype(jnp.bfloat16)

    # Pad the batch to a sublane multiple and tile it; "parallel" grid axis lets
    # v7x shard batch tiles across its two TensorCores.
    if B <= 128:
        bt = _round_up(max(B, 1), 8)
        b_pad = bt
    else:
        bt = 128
        b_pad = _round_up(B, 128)
    xb = jnp.zeros((b_pad, in_f), jnp.bfloat16).at[:B].set(xf.astype(jnp.bfloat16))

    seed_arr = jnp.asarray([seed], dtype=jnp.int32)
    grid = (b_pad // bt,)

    kernel = functools.partial(
        _linear5_kernel,
        threshold31=int(round(p * (1 << 31))),
        batch_tile=bt,
    )

    out = pl.pallas_call(
        kernel,
        out_shape=jax.ShapeDtypeStruct((b_pad, n_pad), jnp.float32),
        grid=grid,
        in_specs=[
            pl.BlockSpec(memory_space=pltpu.MemorySpace.SMEM),       # seed scalar
            pl.BlockSpec((bt, in_f), lambda i: (i, 0)),              # x tile
            pl.BlockSpec((in_f, hidden), lambda i: (0, 0)),          # w1 (resident)
            pl.BlockSpec((hidden, hidden), lambda i: (0, 0)),        # w2
            pl.BlockSpec((hidden, hidden), lambda i: (0, 0)),        # w3
            pl.BlockSpec((hidden, hidden), lambda i: (0, 0)),        # w4
            pl.BlockSpec((hidden, n_pad), lambda i: (0, 0)),         # w5 (padded)
        ],
        out_specs=pl.BlockSpec((bt, n_pad), lambda i: (i, 0)),
        compiler_params=pltpu.CompilerParams(
            dimension_semantics=("parallel",),
            vmem_limit_bytes=32 * 1024 * 1024,
        ),
    )(seed_arr, xb, w1b, w2b, w3b, w4b, w5b)

    return out[:B, :n_class]


def init_params(key, in_feature, hidden_feature, n_class):
    """Deterministic init mirroring nn.Linear's U(-1/sqrt(fan_in), 1/sqrt(fan_in)).

    Weights are created directly in (in, out) layout (already transposed
    relative to PyTorch's (out, in))."""
    dims = [(in_feature, hidden_feature),
            (hidden_feature, hidden_feature),
            (hidden_feature, hidden_feature),
            (hidden_feature, hidden_feature),
            (hidden_feature, n_class)]
    keys = jax.random.split(key, len(dims))
    params = []
    for k, (fan_in, fan_out) in zip(keys, dims):
        bound = 1.0 / (fan_in ** 0.5)
        params.append(jax.random.uniform(
            k, (fan_in, fan_out), jnp.float32, minval=-bound, maxval=bound))
    return tuple(params)


if __name__ == "__main__":
    key = jax.random.PRNGKey(0)
    k_x, k_w = jax.random.split(key)

    # Small, forward-consistent shapes: x is (B, C, H, W) = (2, 4, 8, 8),
    # so in_feature = 4*8*8 = 256 after flatten; hidden = 256; n_class = 10.
    B, C, H, W = 2, 4, 8, 8
    in_feature = C * H * W
    hidden_feature = in_feature
    n_class = 10

    x = jax.random.normal(k_x, (B, C, H, W), jnp.float32)
    params = init_params(k_w, in_feature, hidden_feature, n_class)

    out = linear5_forward(x, params, seed=0, p=0.1)
    jax.block_until_ready(out)

    assert out.shape == (B, n_class)
    assert out.dtype == jnp.float32
    assert bool(jnp.all(jnp.isfinite(out)))
    print("KERNEL_OK")
</pallas_src>

<mosaic_0001>
module attributes {stable_mosaic.version = 11 : i64} {
  func.func @_linear5_kernel(%arg0: i32, %arg1: memref<1xi32, #tpu.memory_space<smem>>, %arg2: memref<8x256xbf16, #tpu.memory_space<vmem>>, %arg3: memref<256x256xbf16, #tpu.memory_space<vmem>>, %arg4: memref<256x256xbf16, #tpu.memory_space<vmem>>, %arg5: memref<256x256xbf16, #tpu.memory_space<vmem>>, %arg6: memref<256x256xbf16, #tpu.memory_space<vmem>>, %arg7: memref<256x128xbf16, #tpu.memory_space<vmem>>, %arg8: memref<8x128xf32, #tpu.memory_space<vmem>>) attributes {dimension_semantics = [#tpu.dimension_semantics<parallel>], iteration_bounds = array<i64: 1>, scalar_prefetch = 0 : i64, scratch_operands = 0 : i64, tpu.core_type = #tpu.core_type<tc>, window_params = [{transform_indices = @transform_0, window_bounds = array<i64: 1>}, {transform_indices = @transform_1, window_bounds = array<i64: 8, 256>}, {pipeline_mode = #tpu.pipeline_mode<synchronous>, transform_indices = @transform_2, window_bounds = array<i64: 256, 256>}, {pipeline_mode = #tpu.pipeline_mode<synchronous>, transform_indices = @transform_3, window_bounds = array<i64: 256, 256>}, {pipeline_mode = #tpu.pipeline_mode<synchronous>, transform_indices = @transform_4, window_bounds = array<i64: 256, 256>}, {pipeline_mode = #tpu.pipeline_mode<synchronous>, transform_indices = @transform_5, window_bounds = array<i64: 256, 256>}, {pipeline_mode = #tpu.pipeline_mode<synchronous>, transform_indices = @transform_6, window_bounds = array<i64: 256, 128>}, {transform_indices = @transform_7, window_bounds = array<i64: 8, 128>}]} {
    %c0 = arith.constant 0 : index
    %0 = memref.load %arg1[%c0] : memref<1xi32, #tpu.memory_space<smem>>
    %c8_i32 = arith.constant 8 : i32
    %1 = arith.muli %arg0, %c8_i32 : i32
    %c0_0 = arith.constant 0 : index
    %c0_1 = arith.constant 0 : index
    %2 = vector.load %arg2[%c0_0, %c0_1] : memref<8x256xbf16, #tpu.memory_space<vmem>>, vector<8x256xbf16>
    %c0_2 = arith.constant 0 : index
    %c0_3 = arith.constant 0 : index
    %3 = vector.load %arg3[%c0_2, %c0_3] : memref<256x256xbf16, #tpu.memory_space<vmem>>, vector<256x256xbf16>
    %cst = arith.constant dense<0.000000e+00> : vector<8x256xf32>
    %4 = tpu.matmul %2, %3, %cst {dimension_numbers = #tpu.dot_dimension_numbers<[1], [0], [0], [1], [0, 0, 1, 1], [], []>} : vector<8x256xbf16>, vector<256x256xbf16>, vector<8x256xf32> -> vector<8x256xf32>
    %cst_4 = arith.constant 0.000000e+00 : f32
    %5 = vector.broadcast %cst_4 : f32 to vector<8x256xf32>
    %6 = arith.maximumf %4, %5 : vector<8x256xf32>
    %7 = tpu.iota {dimensions = array<i32: 0>} : vector<8x256xi32>
    %8 = vector.broadcast %1 : i32 to vector<8x256xi32>
    %9 = arith.addi %7, %8 : vector<8x256xi32>
    %10 = tpu.iota {dimensions = array<i32: 1>} : vector<8x256xi32>
    %c256_i32 = arith.constant 256 : i32
    %11 = vector.broadcast %c256_i32 : i32 to vector<8x256xi32>
    %12 = arith.muli %9, %11 : vector<8x256xi32>
    %13 = arith.addi %12, %10 : vector<8x256xi32>
    %c-1640531527_i32 = arith.constant -1640531527 : i32
    %14 = arith.muli %0, %c-1640531527_i32 : i32
    %15 = vector.broadcast %14 : i32 to vector<8x256xi32>
    %16 = arith.addi %13, %15 : vector<8x256xi32>
    %c1_i32 = arith.constant 1 : i32
    %c-2048144789_i32 = arith.constant -2048144789 : i32
    %17 = arith.muli %c1_i32, %c-2048144789_i32 : i32
    %18 = vector.broadcast %17 : i32 to vector<8x256xi32>
    %19 = arith.addi %16, %18 : vector<8x256xi32>
    %c16_i32 = arith.constant 16 : i32
    %20 = vector.broadcast %c16_i32 : i32 to vector<8x256xi32>
    %21 = arith.shrui %19, %20 : vector<8x256xi32>
    %22 = arith.xori %19, %21 : vector<8x256xi32>
    %c2146121005_i32 = arith.constant 2146121005 : i32
    %23 = vector.broadcast %c2146121005_i32 : i32 to vector<8x256xi32>
    %24 = arith.muli %22, %23 : vector<8x256xi32>
    %c15_i32 = arith.constant 15 : i32
    %25 = vector.broadcast %c15_i32 : i32 to vector<8x256xi32>
    %26 = arith.shrui %24, %25 : vector<8x256xi32>
    %27 = arith.xori %24, %26 : vector<8x256xi32>
    %c-2073254261_i32 = arith.constant -2073254261 : i32
    %28 = vector.broadcast %c-2073254261_i32 : i32 to vector<8x256xi32>
    %29 = arith.muli %27, %28 : vector<8x256xi32>
    %c16_i32_5 = arith.constant 16 : i32
    %30 = vector.broadcast %c16_i32_5 : i32 to vector<8x256xi32>
    %31 = arith.shrui %29, %30 : vector<8x256xi32>
    %32 = arith.xori %29, %31 : vector<8x256xi32>
    %c1_i32_6 = arith.constant 1 : i32
    %33 = vector.broadcast %c1_i32_6 : i32 to vector<8x256xi32>
    %34 = arith.shrui %32, %33 : vector<8x256xi32>
    %c214748365_i32 = arith.constant 214748365 : i32
    %35 = vector.broadcast %c214748365_i32 : i32 to vector<8x256xi32>
    %36 = arith.cmpi sge, %34, %35 : vector<8x256xi32>
    %cst_7 = arith.constant 0.000000e+00 : f32
    %37 = vector.broadcast %cst_7 : f32 to vector<8x256xf32>
    %38 = arith.select %36, %6, %37 : vector<8x256xi1>, vector<8x256xf32>
    %39 = arith.truncf %38 : vector<8x256xf32> to vector<8x256xbf16>
    %c0_8 = arith.constant 0 : index
    %c0_9 = arith.constant 0 : index
    %40 = vector.load %arg4[%c0_8, %c0_9] : memref<256x256xbf16, #tpu.memory_space<vmem>>, vector<256x256xbf16>
    %cst_10 = arith.constant dense<0.000000e+00> : vector<8x256xf32>
    %41 = tpu.matmul %39, %40, %cst_10 {dimension_numbers = #tpu.dot_dimension_numbers<[1], [0], [0], [1], [0, 0, 1, 1], [], []>} : vector<8x256xbf16>, vector<256x256xbf16>, vector<8x256xf32> -> vector<8x256xf32>
    %cst_11 = arith.constant 0.000000e+00 : f32
    %42 = vector.broadcast %cst_11 : f32 to vector<8x256xf32>
    %43 = arith.maximumf %41, %42 : vector<8x256xf32>
    %44 = tpu.iota {dimensions = array<i32: 0>} : vector<8x256xi32>
    %45 = vector.broadcast %1 : i32 to vector<8x256xi32>
    %46 = arith.addi %44, %45 : vector<8x256xi32>
    %47 = tpu.iota {dimensions = array<i32: 1>} : vector<8x256xi32>
    %c256_i32_12 = arith.constant 256 : i32
    %48 = vector.broadcast %c256_i32_12 : i32 to vector<8x256xi32>
    %49 = arith.muli %46, %48 : vector<8x256xi32>
    %50 = arith.addi %49, %47 : vector<8x256xi32>
    %c-1640531527_i32_13 = arith.constant -1640531527 : i32
    %51 = arith.muli %0, %c-1640531527_i32_13 : i32
    %52 = vector.broadcast %51 : i32 to vector<8x256xi32>
    %53 = arith.addi %50, %52 : vector<8x256xi32>
    %c2_i32 = arith.constant 2 : i32
    %c-2048144789_i32_14 = arith.constant -2048144789 : i32
    %54 = arith.muli %c2_i32, %c-2048144789_i32_14 : i32
    %55 = vector.broadcast %54 : i32 to vector<8x256xi32>
    %56 = arith.addi %53, %55 : vector<8x256xi32>
    %c16_i32_15 = arith.constant 16 : i32
    %57 = vector.broadcast %c16_i32_15 : i32 to vector<8x256xi32>
    %58 = arith.shrui %56, %57 : vector<8x256xi32>
    %59 = arith.xori %56, %58 : vector<8x256xi32>
    %c2146121005_i32_16 = arith.constant 2146121005 : i32
    %60 = vector.broadcast %c2146121005_i32_16 : i32 to vector<8x256xi32>
    %61 = arith.muli %59, %60 : vector<8x256xi32>
    %c15_i32_17 = arith.constant 15 : i32
    %62 = vector.broadcast %c15_i32_17 : i32 to vector<8x256xi32>
    %63 = arith.shrui %61, %62 : vector<8x256xi32>
    %64 = arith.xori %61, %63 : vector<8x256xi32>
    %c-2073254261_i32_18 = arith.constant -2073254261 : i32
    %65 = vector.broadcast %c-2073254261_i32_18 : i32 to vector<8x256xi32>
    %66 = arith.muli %64, %65 : vector<8x256xi32>
    %c16_i32_19 = arith.constant 16 : i32
    %67 = vector.broadcast %c16_i32_19 : i32 to vector<8x256xi32>
    %68 = arith.shrui %66, %67 : vector<8x256xi32>
    %69 = arith.xori %66, %68 : vector<8x256xi32>
    %c1_i32_20 = arith.constant 1 : i32
    %70 = vector.broadcast %c1_i32_20 : i32 to vector<8x256xi32>
    %71 = arith.shrui %69, %70 : vector<8x256xi32>
    %c214748365_i32_21 = arith.constant 214748365 : i32
    %72 = vector.broadcast %c214748365_i32_21 : i32 to vector<8x256xi32>
    %73 = arith.cmpi sge, %71, %72 : vector<8x256xi32>
    %cst_22 = arith.constant 0.000000e+00 : f32
    %74 = vector.broadcast %cst_22 : f32 to vector<8x256xf32>
    %75 = arith.select %73, %43, %74 : vector<8x256xi1>, vector<8x256xf32>
    %76 = arith.truncf %75 : vector<8x256xf32> to vector<8x256xbf16>
    %c0_23 = arith.constant 0 : index
    %c0_24 = arith.constant 0 : index
    %77 = vector.load %arg5[%c0_23, %c0_24] : memref<256x256xbf16, #tpu.memory_space<vmem>>, vector<256x256xbf16>
    %cst_25 = arith.constant dense<0.000000e+00> : vector<8x256xf32>
    %78 = tpu.matmul %76, %77, %cst_25 {dimension_numbers = #tpu.dot_dimension_numbers<[1], [0], [0], [1], [0, 0, 1, 1], [], []>} : vector<8x256xbf16>, vector<256x256xbf16>, vector<8x256xf32> -> vector<8x256xf32>
    %cst_26 = arith.constant 0.000000e+00 : f32
    %79 = vector.broadcast %cst_26 : f32 to vector<8x256xf32>
    %80 = arith.maximumf %78, %79 : vector<8x256xf32>
    %81 = tpu.iota {dimensions = array<i32: 0>} : vector<8x256xi32>
    %82 = vector.broadcast %1 : i32 to vector<8x256xi32>
    %83 = arith.addi %81, %82 : vector<8x256xi32>
    %84 = tpu.iota {dimensions = array<i32: 1>} : vector<8x256xi32>
    %c256_i32_27 = arith.constant 256 : i32
    %85 = vector.broadcast %c256_i32_27 : i32 to vector<8x256xi32>
    %86 = arith.muli %83, %85 : vector<8x256xi32>
    %87 = arith.addi %86, %84 : vector<8x256xi32>
    %c-1640531527_i32_28 = arith.constant -1640531527 : i32
    %88 = arith.muli %0, %c-1640531527_i32_28 : i32
    %89 = vector.broadcast %88 : i32 to vector<8x256xi32>
    %90 = arith.addi %87, %89 : vector<8x256xi32>
    %c3_i32 = arith.constant 3 : i32
    %c-2048144789_i32_29 = arith.constant -2048144789 : i32
    %91 = arith.muli %c3_i32, %c-2048144789_i32_29 : i32
    %92 = vector.broadcast %91 : i32 to vector<8x256xi32>
    %93 = arith.addi %90, %92 : vector<8x256xi32>
    %c16_i32_30 = arith.constant 16 : i32
    %94 = vector.broadcast %c16_i32_30 : i32 to vector<8x256xi32>
    %95 = arith.shrui %93, %94 : vector<8x256xi32>
    %96 = arith.xori %93, %95 : vector<8x256xi32>
    %c2146121005_i32_31 = arith.constant 2146121005 : i32
    %97 = vector.broadcast %c2146121005_i32_31 : i32 to vector<8x256xi32>
    %98 = arith.muli %96, %97 : vector<8x256xi32>
    %c15_i32_32 = arith.constant 15 : i32
    %99 = vector.broadcast %c15_i32_32 : i32 to vector<8x256xi32>
    %100 = arith.shrui %98, %99 : vector<8x256xi32>
    %101 = arith.xori %98, %100 : vector<8x256xi32>
    %c-2073254261_i32_33 = arith.constant -2073254261 : i32
    %102 = vector.broadcast %c-2073254261_i32_33 : i32 to vector<8x256xi32>
    %103 = arith.muli %101, %102 : vector<8x256xi32>
    %c16_i32_34 = arith.constant 16 : i32
    %104 = vector.broadcast %c16_i32_34 : i32 to vector<8x256xi32>
    %105 = arith.shrui %103, %104 : vector<8x256xi32>
    %106 = arith.xori %103, %105 : vector<8x256xi32>
    %c1_i32_35 = arith.constant 1 : i32
    %107 = vector.broadcast %c1_i32_35 : i32 to vector<8x256xi32>
    %108 = arith.shrui %106, %107 : vector<8x256xi32>
    %c214748365_i32_36 = arith.constant 214748365 : i32
    %109 = vector.broadcast %c214748365_i32_36 : i32 to vector<8x256xi32>
    %110 = arith.cmpi sge, %108, %109 : vector<8x256xi32>
    %cst_37 = arith.constant 0.000000e+00 : f32
    %111 = vector.broadcast %cst_37 : f32 to vector<8x256xf32>
    %112 = arith.select %110, %80, %111 : vector<8x256xi1>, vector<8x256xf32>
    %113 = arith.truncf %112 : vector<8x256xf32> to vector<8x256xbf16>
    %c0_38 = arith.constant 0 : index
    %c0_39 = arith.constant 0 : index
    %114 = vector.load %arg6[%c0_38, %c0_39] : memref<256x256xbf16, #tpu.memory_space<vmem>>, vector<256x256xbf16>
    %cst_40 = arith.constant dense<0.000000e+00> : vector<8x256xf32>
    %115 = tpu.matmul %113, %114, %cst_40 {dimension_numbers = #tpu.dot_dimension_numbers<[1], [0], [0], [1], [0, 0, 1, 1], [], []>} : vector<8x256xbf16>, vector<256x256xbf16>, vector<8x256xf32> -> vector<8x256xf32>
    %cst_41 = arith.constant 0.000000e+00 : f32
    %116 = vector.broadcast %cst_41 : f32 to vector<8x256xf32>
    %117 = arith.maximumf %115, %116 : vector<8x256xf32>
    %118 = tpu.iota {dimensions = array<i32: 0>} : vector<8x256xi32>
    %119 = vector.broadcast %1 : i32 to vector<8x256xi32>
    %120 = arith.addi %118, %119 : vector<8x256xi32>
    %121 = tpu.iota {dimensions = array<i32: 1>} : vector<8x256xi32>
    %c256_i32_42 = arith.constant 256 : i32
    %122 = vector.broadcast %c256_i32_42 : i32 to vector<8x256xi32>
    %123 = arith.muli %120, %122 : vector<8x256xi32>
    %124 = arith.addi %123, %121 : vector<8x256xi32>
    %c-1640531527_i32_43 = arith.constant -1640531527 : i32
    %125 = arith.muli %0, %c-1640531527_i32_43 : i32
    %126 = vector.broadcast %125 : i32 to vector<8x256xi32>
    %127 = arith.addi %124, %126 : vector<8x256xi32>
    %c4_i32 = arith.constant 4 : i32
    %c-2048144789_i32_44 = arith.constant -2048144789 : i32
    %128 = arith.muli %c4_i32, %c-2048144789_i32_44 : i32
    %129 = vector.broadcast %128 : i32 to vector<8x256xi32>
    %130 = arith.addi %127, %129 : vector<8x256xi32>
    %c16_i32_45 = arith.constant 16 : i32
    %131 = vector.broadcast %c16_i32_45 : i32 to vector<8x256xi32>
    %132 = arith.shrui %130, %131 : vector<8x256xi32>
    %133 = arith.xori %130, %132 : vector<8x256xi32>
    %c2146121005_i32_46 = arith.constant 2146121005 : i32
    %134 = vector.broadcast %c2146121005_i32_46 : i32 to vector<8x256xi32>
    %135 = arith.muli %133, %134 : vector<8x256xi32>
    %c15_i32_47 = arith.constant 15 : i32
    %136 = vector.broadcast %c15_i32_47 : i32 to vector<8x256xi32>
    %137 = arith.shrui %135, %136 : vector<8x256xi32>
    %138 = arith.xori %135, %137 : vector<8x256xi32>
    %c-2073254261_i32_48 = arith.constant -2073254261 : i32
    %139 = vector.broadcast %c-2073254261_i32_48 : i32 to vector<8x256xi32>
    %140 = arith.muli %138, %139 : vector<8x256xi32>
    %c16_i32_49 = arith.constant 16 : i32
    %141 = vector.broadcast %c16_i32_49 : i32 to vector<8x256xi32>
    %142 = arith.shrui %140, %141 : vector<8x256xi32>
    %143 = arith.xori %140, %142 : vector<8x256xi32>
    %c1_i32_50 = arith.constant 1 : i32
    %144 = vector.broadcast %c1_i32_50 : i32 to vector<8x256xi32>
    %145 = arith.shrui %143, %144 : vector<8x256xi32>
    %c214748365_i32_51 = arith.constant 214748365 : i32
    %146 = vector.broadcast %c214748365_i32_51 : i32 to vector<8x256xi32>
    %147 = arith.cmpi sge, %145, %146 : vector<8x256xi32>
    %cst_52 = arith.constant 0.000000e+00 : f32
    %148 = vector.broadcast %cst_52 : f32 to vector<8x256xf32>
    %149 = arith.select %147, %117, %148 : vector<8x256xi1>, vector<8x256xf32>
    %150 = arith.truncf %149 : vector<8x256xf32> to vector<8x256xbf16>
    %c0_53 = arith.constant 0 : index
    %c0_54 = arith.constant 0 : index
    %151 = vector.load %arg7[%c0_53, %c0_54] : memref<256x128xbf16, #tpu.memory_space<vmem>>, vector<256x128xbf16>
    %cst_55 = arith.constant dense<0.000000e+00> : vector<8x128xf32>
    %152 = tpu.matmul %150, %151, %cst_55 {dimension_numbers = #tpu.dot_dimension_numbers<[1], [0], [0], [1], [0, 0, 1, 1], [], []>} : vector<8x256xbf16>, vector<256x128xbf16>, vector<8x128xf32> -> vector<8x128xf32>
    %c0_56 = arith.constant 0 : index
    %c0_57 = arith.constant 0 : index
    %153 = vector.load %arg8[%c0_56, %c0_57] : memref<8x128xf32, #tpu.memory_space<vmem>>, vector<8x128xf32>
    tpu.vector_store %arg8[%c0_56, %c0_57], %152 {strides = array<i32>} : memref<8x128xf32, #tpu.memory_space<vmem>>, vector<8x128xf32>,
    return
  }
  func.func @transform_0(%arg0: i32) -> i32 {
    %c0_i32 = arith.constant 0 : i32
    %c0_i32_0 = arith.constant 0 : i32
    return %c0_i32 : i32
  }
  func.func @transform_1(%arg0: i32) -> (i32, i32) {
    %c0_i32 = arith.constant 0 : i32
    %c0_i32_0 = arith.constant 0 : i32
    return %arg0, %c0_i32 : i32, i32
  }
  func.func @transform_2(%arg0: i32) -> (i32, i32) {
    %c0_i32 = arith.constant 0 : i32
    %c0_i32_0 = arith.constant 0 : i32
    %c0_i32_1 = arith.constant 0 : i32
    return %c0_i32, %c0_i32_0 : i32, i32
  }
  func.func @transform_3(%arg0: i32) -> (i32, i32) {
    %c0_i32 = arith.constant 0 : i32
    %c0_i32_0 = arith.constant 0 : i32
    %c0_i32_1 = arith.constant 0 : i32
    return %c0_i32, %c0_i32_0 : i32, i32
  }
  func.func @transform_4(%arg0: i32) -> (i32, i32) {
    %c0_i32 = arith.constant 0 : i32
    %c0_i32_0 = arith.constant 0 : i32
    %c0_i32_1 = arith.constant 0 : i32
    return %c0_i32, %c0_i32_0 : i32, i32
  }
  func.func @transform_5(%arg0: i32) -> (i32, i32) {
    %c0_i32 = arith.constant 0 : i32
    %c0_i32_0 = arith.constant 0 : i32
    %c0_i32_1 = arith.constant 0 : i32
    return %c0_i32, %c0_i32_0 : i32, i32
  }
  func.func @transform_6(%arg0: i32) -> (i32, i32) {
    %c0_i32 = arith.constant 0 : i32
    %c0_i32_0 = arith.constant 0 : i32
    %c0_i32_1 = arith.constant 0 : i32
    return %c0_i32, %c0_i32_0 : i32, i32
  }
  func.func @transform_7(%arg0: i32) -> (i32, i32) {
    %c0_i32 = arith.constant 0 : i32
    %c0_i32_0 = arith.constant 0 : i32
    return %arg0, %c0_i32 : i32, i32
  }
}

</mosaic_0001>

<bundles_post_ra>
// kernel: tpu_custom_call.1
= control target key start
LH: loop header
LB: loop body
LE: loop exit
PB: predicated region body
PF: predicated region fallthrough
CT: control target
= control target key end

     0   :  { %13 = vsyncpa [#allocation4], 0  ;;  %s2109_s0 = inlined_call_operand.<no memory space> [shape: s32[1], index: 0, kind: input, shape index: {}]   ;;  %s2110_s1 = inlined_call_operand.hbm [shape: bf16[8,256], index: 1, kind: input, shape index: {}]   ;;  %s2111_s2 = inlined_call_operand.hbm [shape: bf16[256,256], index: 2, kind: input, shape index: {}]   ;;  %s2112_s3 = inlined_call_operand.hbm [shape: bf16[256,256], index: 3, kind: input, shape index: {}]   ;;  %s2113_s4 = inlined_call_operand.hbm [shape: bf16[256,256], index: 4, kind: input, shape index: {}]   ;;  %s2114_s5 = inlined_call_operand.hbm [shape: bf16[256,256], index: 5, kind: input, shape index: {}]   ;;  %s2115_s6 = inlined_call_operand.hbm [shape: bf16[256,128], index: 6, kind: input, shape index: {}]   ;;  %s2116_s7 = inlined_call_operand.hbm [shape: f32[8,128], index: 7, kind: output, shape index: {}]  }
   0x1   :  { %14 = vsyncpa [#allocation7], 0 }
   0x2   :  { %15 = vsyncpa [#allocation10], 0 }
   0x3   :  { %16 = vsyncpa [#allocation13], 0 }
   0x4   :  { %17 = vsyncpa [#allocation5], 0  ;;  %s1941_s24 = smov [#allocation6]   ;;  %s1777_s28 = scalar_lea.hbm %s2111_s2, 4096 }
   0x5   :  { %s35_s25 = sshll.u32 %s1941_s24, 4  ;;  %p1778_p0 = scmp.ne.s32.totalorder %s2111_s2, %s1777_s28  ;;  %s36_s25 = int_to_ptr.vmem [resolvable:$true] %s35_s25 }
   0x6   :  { %p1781_p1 = scmp.lt.u32.totalorder %s1777_s28, %s2111_s2 }
   0x8   :  { %p1783_p2 = pnand %p1781_p1, %p1778_p0 }
   0xa   :  { %1786 = shalt.err (!%p1783_p2)
}
   0xb   :  { %s1787_s10 = scalar_lea.vmem %s36_s25, 4096  ;;  %p1792_p4 = scmp.lt.s32.totalorder %s36_s25, %s36_s25 }
   0xc   :  { %p1788_p3 = scmp.ne.s32.totalorder %s36_s25, %s1787_s10  ;;  %p1793_p5 = scmp.lt.s32.totalorder %s1787_s10, %s1787_s10 }
   0xe   :  { %p1794_p6 = por %p1793_p5, %p1792_p4 }
  0x10   :  { %p1795_p7 = pnand %p1794_p6, %p1788_p3 }
  0x12   :  { %1798 = shalt.err (!%p1795_p7)
}
  0x13   :  { %s1942_s11 = smov 128   ;;  %s1943_s12 = smov 8  }
  0x14   :  { %41 = dma.hbm_to_vmem [thread:$0]  %s2111_s2, 4096, %s36_s25, [#allocation7], %s1942_s11, %s1942_s11, %s1943_s12  }
  0x15   :  { %s1944_s15 = smov [#allocation9]   ;;  %s1945_s17 = smov [#allocation3]  }
  0x16   :  { %s59_s16 = sshll.u32 %s1944_s15, 4  ;;  %s26_s18 = sshll.u32 %s1945_s17, 4  ;;  %s60_s16 = int_to_ptr.vmem [resolvable:$true] %s59_s16  ;;  %s27_s18 = int_to_ptr.vmem [resolvable:$true] %s26_s18 }
  0x17   :  { %s1799_s21 = scalar_lea.hbm %s2113_s4, 4096 }
  0x18   :  { %p1800_p8 = scmp.ne.s32.totalorder %s2113_s4, %s1799_s21  ;;  %p1803_p9 = scmp.lt.u32.totalorder %s1799_s21, %s2113_s4 }
  0x1a   :  { %p1805_p10 = pnand %p1803_p9, %p1800_p8 }
  0x1c   :  { %1808 = shalt.err (!%p1805_p10)
}
  0x1d   :  { %s1809_s2 = scalar_lea.vmem %s60_s16, 4096  ;;  %p1814_p12 = scmp.lt.s32.totalorder %s60_s16, %s60_s16 }
  0x1e   :  { %p1810_p11 = scmp.ne.s32.totalorder %s60_s16, %s1809_s2  ;;  %p1815_p13 = scmp.lt.s32.totalorder %s1809_s2, %s1809_s2 }
  0x20   :  { %p1816_p0 = por %p1815_p13, %p1814_p12 }
  0x22   :  { %p1817_p1 = pnand %p1816_p0, %p1810_p11 }
  0x24   :  { %1820 = shalt.err (!%p1817_p1)
}
  0x25   :  { %65 = dma.hbm_to_vmem [thread:$0]  %s2113_s4, 4096, %s60_s16, [#allocation10], %s1942_s11, %s1942_s11, %s1943_s12  }
  0x26   :  { %s1821_s30 = scalar_lea.hbm %s2110_s1, 128 }
  0x27   :  { %p1822_p2 = scmp.ne.s32.totalorder %s2110_s1, %s1821_s30  ;;  %p1825_p3 = scmp.lt.u32.totalorder %s1821_s30, %s2110_s1 }
  0x29   :  { %p1827_p4 = pnand %p1825_p3, %p1822_p2 }
  0x2b   :  { %1830 = shalt.err (!%p1827_p4)
}
  0x2c   :  { %s1831_s14 = scalar_lea.vmem %s27_s18, 128  ;;  %p1836_p6 = scmp.lt.s32.totalorder %s27_s18, %s27_s18 }
  0x2d   :  { %p1832_p5 = scmp.ne.s32.totalorder %s27_s18, %s1831_s14  ;;  %p1837_p7 = scmp.lt.s32.totalorder %s1831_s14, %s1831_s14 }
  0x2f   :  { %p1838_p8 = por %p1837_p7, %p1836_p6 }
  0x31   :  { %p1839_p9 = pnand %p1838_p8, %p1832_p5 }
  0x33   :  { %1842 = shalt.err (!%p1839_p9)
}
  0x34   :  { %29 = dma.hbm_to_vmem [thread:$0]  %s2110_s1, 128, %s27_s18, [#allocation4]  }
  0x35   :  { %s1946_s16 = smov [#allocation8]   ;;  %s1947_s19 = smov [#allocation11]  }
  0x36   :  { %s47_s17 = sshll.u32 %s1946_s16, 4  ;;  %s71_s20 = sshll.u32 %s1947_s19, 4  ;;  %s48_s17 = int_to_ptr.vmem [resolvable:$true] %s47_s17  ;;  %s72_s20 = int_to_ptr.vmem [resolvable:$true] %s71_s20 }
  0x37   :  { %s1843_s23 = scalar_lea.hbm %s2112_s3, 4096 }
  0x38   :  { %p1844_p10 = scmp.ne.s32.totalorder %s2112_s3, %s1843_s23  ;;  %p1847_p11 = scmp.lt.u32.totalorder %s1843_s23, %s2112_s3 }
  0x3a   :  { %p1849_p12 = pnand %p1847_p11, %p1844_p10 }
  0x3c   :  { %1852 = shalt.err (!%p1849_p12)
}
  0x3d   :  { %s1853_s1 = scalar_lea.vmem %s48_s17, 4096  ;;  %p1858_p0 = scmp.lt.s32.totalorder %s48_s17, %s48_s17 }
  0x3e   :  { %p1854_p13 = scmp.ne.s32.totalorder %s48_s17, %s1853_s1  ;;  %p1859_p1 = scmp.lt.s32.totalorder %s1853_s1, %s1853_s1 }
  0x40   :  { %p1860_p2 = por %p1859_p1, %p1858_p0 }
  0x42   :  { %p1861_p3 = pnand %p1860_p2, %p1854_p13 }
  0x44   :  { %1864 = shalt.err (!%p1861_p3)
}
  0x45   :  { %53 = dma.hbm_to_vmem [thread:$0]  %s2112_s3, 4096, %s48_s17, [#allocation7], %s1942_s11, %s1942_s11, %s1943_s12  }
  0x46   :  { %s1865_s30 = scalar_lea.hbm %s2114_s5, 4096 }
  0x47   :  { %p1866_p4 = scmp.ne.s32.totalorder %s2114_s5, %s1865_s30  ;;  %p1869_p5 = scmp.lt.u32.totalorder %s1865_s30, %s2114_s5 }
  0x49   :  { %p1871_p6 = pnand %p1869_p5, %p1866_p4 }
  0x4b   :  { %1874 = shalt.err (!%p1871_p6)
}
  0x4c   :  { %s1875_s14 = scalar_lea.vmem %s72_s20, 4096  ;;  %p1880_p8 = scmp.lt.s32.totalorder %s72_s20, %s72_s20 }
  0x4d   :  { %p1876_p7 = scmp.ne.s32.totalorder %s72_s20, %s1875_s14  ;;  %p1881_p9 = scmp.lt.s32.totalorder %s1875_s14, %s1875_s14 }
  0x4f   :  { %p1882_p10 = por %p1881_p9, %p1880_p8 }
  0x51   :  { %p1883_p11 = pnand %p1882_p10, %p1876_p7 }
  0x53   :  { %1886 = shalt.err (!%p1883_p11)
}
  0x54   :  { %77 = dma.hbm_to_vmem [thread:$0]  %s2114_s5, 4096, %s72_s20, [#allocation10], %s1942_s11, %s1942_s11, %s1943_s12  }
  0x55   :  { %s1948_s15 = smov [#allocation12]   ;;  %s1887_s21 = scalar_lea.hbm %s2115_s6, 2048 }
  0x56   :  { %s83_s16 = sshll.u32 %s1948_s15, 4  ;;  %p1888_p12 = scmp.ne.s32.totalorder %s2115_s6, %s1887_s21  ;;  %s84_s16 = int_to_ptr.vmem [resolvable:$true] %s83_s16 }
  0x57   :  { %p1891_p13 = scmp.lt.u32.totalorder %s1887_s21, %s2115_s6 }
  0x59   :  { %p1893_p0 = pnand %p1891_p13, %p1888_p12 }
  0x5b   :  { %1896 = shalt.err (!%p1893_p0)
}
  0x5c   :  { %s1897_s2 = scalar_lea.vmem %s84_s16, 2048  ;;  %p1902_p2 = scmp.lt.s32.totalorder %s84_s16, %s84_s16 }
  0x5d   :  { %p1898_p1 = scmp.ne.s32.totalorder %s84_s16, %s1897_s2  ;;  %p1903_p3 = scmp.lt.s32.totalorder %s1897_s2, %s1897_s2 }
  0x5f   :  { %p1904_p4 = por %p1903_p3, %p1902_p2 }
  0x61   :  { %p1905_p5 = pnand %p1904_p4, %p1898_p1 }
  0x63   :  { %1908 = shalt.err (!%p1905_p5)
}
  0x64   :  { %s1949_s5 = smov 64   ;;  %s1950_s11 = smov 4  }
  0x65   :  { %89 = dma.hbm_to_vmem [thread:$0]  %s2115_s6, 2048, %s84_s16, [#allocation13], %s1949_s5, %s1949_s5, %s1950_s11  }
  0x66   :  { %1931 = dma.done.wait [#allocation4], 128  }
  0x67   :  { %1932 = vsyncadd [#allocation4], 4294967168 }
  0x68   :  { %1933 = dma.done.wait [#allocation7], 8192  }
  0x69   :  { %1934 = vsyncadd [#allocation7], 4294959104 }
  0x6a   :  { %1935 = dma.done.wait [#allocation10], 8192  }
  0x6b   :  { %1936 = vsyncadd [#allocation10], 4294959104 }
  0x6c   :  { %1937 = dma.done.wait [#allocation13], 2048  }
  0x6d   :  { %1938 = vsyncadd [#allocation13], 4294965248  ;;  %v1567_v0 = vld [vmem:[#allocation6 + $0x4] ss:$8 sps:$4 sm:$0xff]   ;;  %v1569_v1 = vld [vmem:[#allocation6] ss:$8 sps:$4 sm:$0xff]  }
  0x6e   :  { %311 = vmatprep.subr.bf16.mxu0 %v1567_v0  ;;  %v1570_v2 = vld [vmem:[#allocation6 + $0x14] ss:$8 sps:$4 sm:$0xff]   ;;  %v1572_v3 = vld [vmem:[#allocation6 + $0x10] ss:$8 sps:$4 sm:$0xff]   ;;  %v1573_v4 = vld [vmem:[#allocation6 + $0x24] ss:$8 sps:$4 sm:$0xff]  }
  0x6f   :  { %312 = vmatpush1.bf16.msra.mxu0 %v1569_v1  ;;  %v1575_v5 = vld [vmem:[#allocation6 + $0x20] ss:$8 sps:$4 sm:$0xff]   ;;  %v1576_v6 = vld [vmem:[#allocation6 + $0x34] ss:$8 sps:$4 sm:$0xff]   ;;  %v1578_v7 = vld [vmem:[#allocation6 + $0x30] ss:$8 sps:$4 sm:$0xff]  }
  0x70   :  { %313 = vmatprep.subr.bf16.mxu0 %v1570_v2  ;;  %v1579_v8 = vld [vmem:[#allocation6 + $0x44] ss:$8 sps:$4 sm:$0xff]   ;;  %v1581_v9 = vld [vmem:[#allocation6 + $0x40] ss:$8 sps:$4 sm:$0xff]   ;;  %v1582_v10 = vld [vmem:[#allocation6 + $0x54] ss:$8 sps:$4 sm:$0xff]  }
  0x71   :  { %v1584_v11 = vld [vmem:[#allocation6 + $0x50] ss:$8 sps:$4 sm:$0xff]   ;;  %v1585_v12 = vld [vmem:[#allocation6 + $0x64] ss:$8 sps:$4 sm:$0xff]   ;;  %v1587_v13 = vld [vmem:[#allocation6 + $0x60] ss:$8 sps:$4 sm:$0xff]  }
  0x72   :  { %v2076_v14 = vld [vmem:[#allocation3] sm:$0xff]  ;;  %v1617_v16 = vld [vmem:[#allocation8 + $0x4] ss:$8 sps:$4 sm:$0xff]   ;;  %v1619_v17 = vld [vmem:[#allocation8] ss:$8 sps:$4 sm:$0xff]  }
  0x73   :  { %314 = vmatpush1.bf16.msra.mxu0 %v1572_v3  ;;  %v1365_v15 = vcombine.high %v2076_v14, %v2076_v14  ;;  %v1620_v18 = vld [vmem:[#allocation8 + $0x14] ss:$8 sps:$4 sm:$0xff]   ;;  %586 = vmatprep.subr.bf16.mxu1 %v1617_v16  ;;  %v1590_v20 = vld [vmem:[#allocation6 + $0x70] ss:$8 sps:$4 sm:$0xff]   ;;  %v1623_v22 = vld [vmem:[#allocation8 + $0x24] ss:$8 sps:$4 sm:$0xff]   ;;  %v1364_v57 = vcombine.low %v2076_v14, %v2076_v14 }
  0x74   :  { %315 = vmatprep.subr.bf16.mxu0 %v1573_v4  ;;  %v1588_v19 = vld [vmem:[#allocation6 + $0x74] ss:$8 sps:$4 sm:$0xff]   ;;  %587 = vmatpush1.bf16.msra.mxu1 %v1619_v17  ;;  %v1622_v21 = vld [vmem:[#allocation8 + $0x10] ss:$8 sps:$4 sm:$0xff]   ;;  %v1591_v23 = vld [vmem:[#allocation6 + $0x84] ss:$8 sps:$4 sm:$0xff]  }
  0x75   :  { %343 = vmatprep.mubr.bf16.mxu0 %v1365_v15  ;;  %588 = vmatprep.subr.bf16.mxu1 %v1620_v18  ;;  %v1593_v24 = vld [vmem:[#allocation6 + $0x80] ss:$8 sps:$4 sm:$0xff]   ;;  %v1626_v26 = vld [vmem:[#allocation8 + $0x34] ss:$8 sps:$4 sm:$0xff]   ;;  %v1596_v28 = vld [vmem:[#allocation6 + $0x90] ss:$8 sps:$4 sm:$0xff]  }
  0x76   :  { %v1625_v25 = vld [vmem:[#allocation8 + $0x20] ss:$8 sps:$4 sm:$0xff]   ;;  %v1594_v27 = vld [vmem:[#allocation6 + $0x94] ss:$8 sps:$4 sm:$0xff]   ;;  %v1628_v29 = vld [vmem:[#allocation8 + $0x30] ss:$8 sps:$4 sm:$0xff]  }
  0x77   :  { %316 = vmatpush1.bf16.msra.mxu0 %v1575_v5  ;;  %v1629_v30 = vld [vmem:[#allocation8 + $0x44] ss:$8 sps:$4 sm:$0xff]   ;;  %v1599_v32 = vld [vmem:[#allocation6 + $0xa0] ss:$8 sps:$4 sm:$0xff]   ;;  %v1600_v33 = vld [vmem:[#allocation6 + $0xb4] ss:$8 sps:$4 sm:$0xff]  }
  0x78   :  { %317 = vmatprep.subr.bf16.mxu0 %v1576_v6  ;;  %589 = vmatpush1.bf16.msra.mxu1 %v1622_v21  ;;  %v1597_v31 = vld [vmem:[#allocation6 + $0xa4] ss:$8 sps:$4 sm:$0xff]   ;;  %v1631_v34 = vld [vmem:[#allocation8 + $0x40] ss:$8 sps:$4 sm:$0xff]   ;;  %v1632_v35 = vld [vmem:[#allocation8 + $0x54] ss:$8 sps:$4 sm:$0xff]  }
  0x79   :  { %590 = vmatprep.subr.bf16.mxu1 %v1623_v22  ;;  %v1634_v36 = vld [vmem:[#allocation8 + $0x50] ss:$8 sps:$4 sm:$0xff]   ;;  %v1635_v38 = vld [vmem:[#allocation8 + $0x64] ss:$8 sps:$4 sm:$0xff]   ;;  %v1637_v40 = vld [vmem:[#allocation8 + $0x60] ss:$8 sps:$4 sm:$0xff]  }
  0x7a   :  { %v1602_v37 = vld [vmem:[#allocation6 + $0xb0] ss:$8 sps:$4 sm:$0xff]   ;;  %v1603_v39 = vld [vmem:[#allocation6 + $0xc4] ss:$8 sps:$4 sm:$0xff]   ;;  %v1605_v41 = vld [vmem:[#allocation6 + $0xc0] ss:$8 sps:$4 sm:$0xff]  }
  0x7b   :  { %318 = vmatpush1.bf16.msra.mxu0 %v1578_v7  ;;  %v1638_v42 = vld [vmem:[#allocation8 + $0x74] ss:$8 sps:$4 sm:$0xff]   ;;  %v1640_v44 = vld [vmem:[#allocation8 + $0x70] ss:$8 sps:$4 sm:$0xff]   ;;  %v1641_v46 = vld [vmem:[#allocation8 + $0x84] ss:$8 sps:$4 sm:$0xff]  }
  0x7c   :  { %319 = vmatprep.subr.bf16.mxu0 %v1579_v8  ;;  %591 = vmatpush1.bf16.msra.mxu1 %v1625_v25  ;;  %v1606_v43 = vld [vmem:[#allocation6 + $0xd4] ss:$8 sps:$4 sm:$0xff]   ;;  %v1608_v45 = vld [vmem:[#allocation6 + $0xd0] ss:$8 sps:$4 sm:$0xff]   ;;  %v1609_v47 = vld [vmem:[#allocation6 + $0xe4] ss:$8 sps:$4 sm:$0xff]  }
  0x7d   :  { %592 = vmatprep.subr.bf16.mxu1 %v1626_v26  ;;  %v1643_v48 = vld [vmem:[#allocation8 + $0x80] ss:$8 sps:$4 sm:$0xff]   ;;  %v1644_v50 = vld [vmem:[#allocation8 + $0x94] ss:$8 sps:$4 sm:$0xff]   ;;  %v1646_v52 = vld [vmem:[#allocation8 + $0x90] ss:$8 sps:$4 sm:$0xff]  }
  0x7e   :  { %v1611_v49 = vld [vmem:[#allocation6 + $0xe0] ss:$8 sps:$4 sm:$0xff]   ;;  %v1612_v51 = vld [vmem:[#allocation6 + $0xf4] ss:$8 sps:$4 sm:$0xff]   ;;  %v1614_v53 = vld [vmem:[#allocation6 + $0xf0] ss:$8 sps:$4 sm:$0xff]  }
  0x7f   :  { %320 = vmatpush1.bf16.msra.mxu0 %v1581_v9  ;;  %v1647_v54 = vld [vmem:[#allocation8 + $0xa4] ss:$8 sps:$4 sm:$0xff]   ;;  %v1649_v55 = vld [vmem:[#allocation8 + $0xa0] ss:$8 sps:$4 sm:$0xff]   ;;  %v1650_v56 = vld [vmem:[#allocation8 + $0xb4] ss:$8 sps:$4 sm:$0xff]  }
  0x80   :  { %321 = vmatprep.subr.bf16.mxu0 %v1582_v10  ;;  %593 = vmatpush1.bf16.msra.mxu1 %v1628_v29  ;;  %v1652_v58 = vld [vmem:[#allocation8 + $0xb0] ss:$8 sps:$4 sm:$0xff]   ;;  %v1653_v59 = vld [vmem:[#allocation8 + $0xc4] ss:$8 sps:$4 sm:$0xff]   ;;  %v1655_v60 = vld [vmem:[#allocation8 + $0xc0] ss:$8 sps:$4 sm:$0xff]  }
  0x81   :  { %594 = vmatprep.subr.bf16.mxu1 %v1629_v30  ;;  %v1656_v61 = vld [vmem:[#allocation8 + $0xd4] ss:$8 sps:$4 sm:$0xff]   ;;  %v1658_v62 = vld [vmem:[#allocation8 + $0xd0] ss:$8 sps:$4 sm:$0xff]   ;;  %v1659_v63 = vld [vmem:[#allocation8 + $0xe4] ss:$8 sps:$4 sm:$0xff]  }
  0x82   :  { %v1661_v0 = vld [vmem:[#allocation8 + $0xe0] ss:$8 sps:$4 sm:$0xff]   ;;  %v1662_v1 = vld [vmem:[#allocation8 + $0xf4] ss:$8 sps:$4 sm:$0xff]   ;;  %v1664_v2 = vld [vmem:[#allocation8 + $0xf0] ss:$8 sps:$4 sm:$0xff]  }
  0x83   :  { %322 = vmatpush1.bf16.msra.mxu0 %v1584_v11  ;;  %v1665_v3 = vld [vmem:[#allocation9] ss:$8 sps:$4 sm:$0xff]   ;;  %v1667_v4 = vld [vmem:[#allocation9 + $0x4] ss:$8 sps:$4 sm:$0xff]   ;;  %v1670_v5 = vld [vmem:[#allocation9 + $0x14] ss:$8 sps:$4 sm:$0xff]  }
  0x84   :  { %323 = vmatprep.subr.bf16.mxu0 %v1585_v12  ;;  %595 = vmatpush1.bf16.msra.mxu1 %v1631_v34  ;;  %v1668_v6 = vld [vmem:[#allocation9 + $0x10] ss:$8 sps:$4 sm:$0xff]   ;;  %v1673_v7 = vld [vmem:[#allocation9 + $0x24] ss:$8 sps:$4 sm:$0xff]   ;;  %v1671_v8 = vld [vmem:[#allocation9 + $0x20] ss:$8 sps:$4 sm:$0xff]  }
  0x85   :  { %596 = vmatprep.subr.bf16.mxu1 %v1632_v35  ;;  %v1676_v9 = vld [vmem:[#allocation9 + $0x34] ss:$8 sps:$4 sm:$0xff]   ;;  %v1674_v10 = vld [vmem:[#allocation9 + $0x30] ss:$8 sps:$4 sm:$0xff]   ;;  %v1679_v11 = vld [vmem:[#allocation9 + $0x44] ss:$8 sps:$4 sm:$0xff]  }
  0x86   :  { %v1677_v12 = vld [vmem:[#allocation9 + $0x40] ss:$8 sps:$4 sm:$0xff]   ;;  %v1680_v14 = vld [vmem:[#allocation9 + $0x50] ss:$8 sps:$4 sm:$0xff]   ;;  %v1685_v15 = vld [vmem:[#allocation9 + $0x64] ss:$8 sps:$4 sm:$0xff]  }
  0x87   :  { %324 = vmatpush1.bf16.msra.mxu0 %v1587_v13  ;;  %v1682_v13 = vld [vmem:[#allocation9 + $0x54] ss:$8 sps:$4 sm:$0xff]   ;;  %v1683_v16 = vld [vmem:[#allocation9 + $0x60] ss:$8 sps:$4 sm:$0xff]   ;;  %v1686_v18 = vld [vmem:[#allocation9 + $0x70] ss:$8 sps:$4 sm:$0xff]  }
  0x88   :  { %325 = vmatprep.subr.bf16.mxu0 %v1588_v19  ;;  %597 = vmatpush1.bf16.msra.mxu1 %v1634_v36  ;;  %v1688_v17 = vld [vmem:[#allocation9 + $0x74] ss:$8 sps:$4 sm:$0xff]   ;;  %v1691_v19 = vld [vmem:[#allocation9 + $0x84] ss:$8 sps:$4 sm:$0xff]   ;;  %v1692_v22 = vld [vmem:[#allocation9 + $0x90] ss:$8 sps:$4 sm:$0xff]  }
  0x89   :  { %598 = vmatprep.subr.bf16.mxu1 %v1635_v38  ;;  %v1694_v21 = vld [vmem:[#allocation9 + $0x94] ss:$8 sps:$4 sm:$0xff]   ;;  %v1698_v26 = vld [vmem:[#allocation9 + $0xb0] ss:$8 sps:$4 sm:$0xff]   ;;  %s364_s1 = smul.u32 2654435769, %s2109_s0 }
  0x8a   :  { %v1700_v25 = vld [vmem:[#allocation9 + $0xb4] ss:$8 sps:$4 sm:$0xff]   ;;  %v1704_v30 = vld [vmem:[#allocation9 + $0xd0] ss:$8 sps:$4 sm:$0xff]   ;;  %s1951_s0 = smov [#allocation14]  }
  0x8b   :  { %326 = vmatpush1.bf16.msra.mxu0 %v1590_v20  ;;  %v1689_v20 = vld [vmem:[#allocation9 + $0x80] ss:$8 sps:$4 sm:$0xff]   ;;  %v1706_v29 = vld [vmem:[#allocation9 + $0xd4] ss:$8 sps:$4 sm:$0xff]   ;;  %s1352_s18 = sshll.u32 %s1951_s0, 4  ;;  %s1353_s18 = int_to_ptr.vmem [resolvable:$true] %s1352_s18 }
  0x8c   :  { %327 = vmatprep.subr.bf16.mxu0 %v1591_v23  ;;  %599 = vmatpush1.bf16.msra.mxu1 %v1637_v40  ;;  %v1697_v23 = vld [vmem:[#allocation9 + $0xa4] ss:$8 sps:$4 sm:$0xff]   ;;  %v365_v40 = vstv %s364_s1  ;;  %s1909_s27 = scalar_lea.vmem %s1353_s18, 128  ;;  %p1914_p7 = scmp.lt.s32.totalorder %s1353_s18, %s1353_s18 }
  0x8d   :  { %600 = vmatprep.subr.bf16.mxu1 %v1638_v42  ;;  %p1910_p6 = scmp.ne.s32.totalorder %s1353_s18, %s1909_s27  ;;  %p1915_p8 = scmp.lt.s32.totalorder %s1909_s27, %s1909_s27 }
  0x8f   :  { %328 = vmatpush1.bf16.msra.mxu0 %v1593_v24  ;;  %v1695_v24 = vld [vmem:[#allocation9 + $0xa0] ss:$8 sps:$4 sm:$0xff]   ;;  %p1916_p9 = por %p1915_p8, %p1914_p7 }
  0x90   :  { %329 = vmatprep.subr.bf16.mxu0 %v1594_v27  ;;  %601 = vmatpush1.bf16.msra.mxu1 %v1640_v44  ;;  %v1703_v27 = vld [vmem:[#allocation9 + $0xc4] ss:$8 sps:$4 sm:$0xff]  }
  0x91   :  { %602 = vmatprep.subr.bf16.mxu1 %v1641_v46  ;;  %p1917_p10 = pnand %p1916_p9, %p1910_p6 }
  0x93   :  { %330 = vmatpush1.bf16.msra.mxu0 %v1596_v28  ;;  %v1701_v28 = vld [vmem:[#allocation9 + $0xc0] ss:$8 sps:$4 sm:$0xff]  }
  0x94   :  { %331 = vmatprep.subr.bf16.mxu0 %v1597_v31  ;;  %603 = vmatpush1.bf16.msra.mxu1 %v1643_v48  ;;  %v1709_v31 = vld [vmem:[#allocation9 + $0xe4] ss:$8 sps:$4 sm:$0xff]  }
  0x95   :  { %604 = vmatprep.subr.bf16.mxu1 %v1644_v50 }
  0x97   :  { %332 = vmatpush1.bf16.msra.mxu0 %v1599_v32  ;;  %v1707_v32 = vld [vmem:[#allocation9 + $0xe0] ss:$8 sps:$4 sm:$0xff]  }
  0x98   :  { %333 = vmatprep.subr.bf16.mxu0 %v1600_v33  ;;  %605 = vmatpush1.bf16.msra.mxu1 %v1646_v52  ;;  %v354_v33 = vlaneseq }
  0x99   :  { %606 = vmatprep.subr.bf16.mxu1 %v1647_v54 }
  0x9a   :  { %v355_v34 = vshrl.u32 %v354_v33, 7  ;;  %v359_v35 = vand.u32 127, %v354_v33  ;;  %v1751_v33 = vld [vmem:[#allocation11 + $0xc4] ss:$8 sps:$4 sm:$0xff]  }
  0x9b   :  { %334 = vmatpush1.bf16.msra.mxu0 %v1602_v37 }
  0x9c   :  { %335 = vmatprep.subr.bf16.mxu0 %v1603_v39  ;;  %607 = vmatpush1.bf16.msra.mxu1 %v1649_v55  ;;  %v360_v36 = vadd.s32 128, %v359_v35  ;;  %v361_v37 = vmul.u32 256, %v355_v34  ;;  %v1749_v34 = vld [vmem:[#allocation11 + $0xc0] ss:$8 sps:$4 sm:$0xff]  }
  0x9d   :  { %608 = vmatprep.subr.bf16.mxu1 %v1650_v56 }
  0x9e   :  { %v363_v38 = vadd.s32 %v361_v37, %v360_v36  ;;  %v362_v39 = vadd.s32 %v361_v37, %v359_v35  ;;  %v1754_v35 = vld [vmem:[#allocation11 + $0xd4] ss:$8 sps:$4 sm:$0xff]   ;;  %v1752_v36 = vld [vmem:[#allocation11 + $0xd0] ss:$8 sps:$4 sm:$0xff]   ;;  %v1757_v37 = vld [vmem:[#allocation11 + $0xe4] ss:$8 sps:$4 sm:$0xff]  }
  0x9f   :  { %336 = vmatpush1.bf16.msra.mxu0 %v1605_v41 }
  0xa0   :  { %337 = vmatprep.subr.bf16.mxu0 %v1606_v43  ;;  %609 = vmatpush1.bf16.msra.mxu1 %v1652_v58  ;;  %v2085_v41 = vadd.s32 %v365_v40, %v363_v38  ;;  %v2087_v42 = vadd.s32 %v365_v40, %v362_v39  ;;  %v1755_v38 = vld [vmem:[#allocation11 + $0xe0] ss:$8 sps:$4 sm:$0xff]  }
  0xa1   :  { %610 = vmatprep.subr.bf16.mxu1 %v1653_v59 }
  0xa2   :  { %v369_v43 = vadd.s32 2246822507, %v2085_v41  ;;  %v368_v44 = vadd.s32 2246822507, %v2087_v42  ;;  %v630_v39 = vadd.s32 198677718, %v2085_v41 }
  0xa3   :  { %338 = vmatpush1.bf16.msra.mxu0 %v1608_v45  ;;  %v629_v40 = vadd.s32 198677718, %v2087_v42 }
  0xa4   :  { %339 = vmatprep.subr.bf16.mxu0 %v1609_v47  ;;  %611 = vmatpush1.bf16.msra.mxu1 %v1655_v60  ;;  %v371_v45 = vshrl.u32 %v369_v43, 16  ;;  %v370_v46 = vshrl.u32 %v368_v44, 16 }
  0xa5   :  { %612 = vmatprep.subr.bf16.mxu1 %v1656_v61 }
  0xa6   :  { %v373_v47 = vxor.u32 %v371_v45, %v369_v43  ;;  %v372_v48 = vxor.u32 %v370_v46, %v368_v44  ;;  %v632_v43 = vshrl.u32 %v630_v39, 16  ;;  %v631_v44 = vshrl.u32 %v629_v40, 16 }
  0xa7   :  { %340 = vmatpush1.bf16.msra.mxu0 %v1611_v49 }
  0xa8   :  { %341 = vmatprep.subr.bf16.mxu0 %v1612_v51  ;;  %613 = vmatpush1.bf16.msra.mxu1 %v1658_v62  ;;  %v375_v49 = vmul.u32 2146121005, %v373_v47  ;;  %v374_v50 = vmul.u32 2146121005, %v372_v48  ;;  %v634_v45 = vxor.u32 %v632_v43, %v630_v39  ;;  %v633_v46 = vxor.u32 %v631_v44, %v629_v40 }
  0xa9   :  { %614 = vmatprep.subr.bf16.mxu1 %v1659_v63 }
  0xaa   :  { %v377_v51 = vshrl.u32 %v375_v49, 15  ;;  %v376_v52 = vshrl.u32 %v374_v50, 15  ;;  %v636_v47 = vmul.u32 2146121005, %v634_v45  ;;  %v635_v48 = vmul.u32 2146121005, %v633_v46 }
  0xab   :  { %342 = vmatpush1.bf16.msra.mxu0 %v1614_v53 }
  0xac   :  { %615 = vmatpush1.bf16.msra.mxu1 %v1661_v0  ;;  %847 = vmatprep.subr.bf16.mxu0 %v1667_v4  ;;  %v379_v53 = vxor.u32 %v377_v51, %v375_v49  ;;  %v378_v54 = vxor.u32 %v376_v52, %v374_v50  ;;  %v638_v49 = vshrl.u32 %v636_v47, 15  ;;  %v637_v50 = vshrl.u32 %v635_v48, 15 }
  0xad   :  { %616 = vmatprep.subr.bf16.mxu1 %v1662_v1 }
  0xae   :  { %344 = vmatmul.mubr.bf16.vlgmr.msra.gmra.mrb[0].mxu0 %v1364_v57  ;;  %v381_v55 = vmul.u32 2221713035, %v379_v53  ;;  %v380_v56 = vmul.u32 2221713035, %v378_v54  ;;  %v640_v51 = vxor.u32 %v638_v49, %v636_v47  ;;  %v639_v52 = vxor.u32 %v637_v50, %v635_v48  ;;  %v1774_v50 = vld [vmem:[#allocation12 + $0x30] sm:$0xff]  }
  0xaf   :  { %848 = vmatpush1.bf16.msra.mxu0 %v1665_v3 }
  0xb0   :  { %617 = vmatpush1.bf16.msra.mxu1 %v1664_v2  ;;  %849 = vmatprep.subr.bf16.mxu0 %v1670_v5  ;;  %v383_v57 = vshrl.u32 %v381_v55, 16  ;;  %v382_v58 = vshrl.u32 %v380_v56, 16  ;;  %v642_v53 = vmul.u32 2221713035, %v640_v51  ;;  %v641_v54 = vmul.u32 2221713035, %v639_v52 }
  0xb1   :  { %v1775_v51 = vld [vmem:[#allocation12 + $0x78] sm:$0xff]  }
  0xb2   :  { %v385_v59 = vxor.u32 %v383_v57, %v381_v55  ;;  %v384_v60 = vxor.u32 %v382_v58, %v380_v56  ;;  %v644_v55 = vshrl.u32 %v642_v53, 16  ;;  %v643_v56 = vshrl.u32 %v641_v54, 16  ;;  %v1776_v52 = vld [vmem:[#allocation12 + $0x38] sm:$0xff]  }
  0xb3   :  { %850 = vmatpush1.bf16.msra.mxu0 %v1668_v6 }
  0xb4   :  { %851 = vmatprep.subr.bf16.mxu0 %v1673_v7  ;;  %v387_v61 = vshrl.u32 %v385_v59, 1  ;;  %v386_v62 = vshrl.u32 %v384_v60, 1  ;;  %v1712_v7 = vld [vmem:[#allocation9 + $0xf4] ss:$8 sps:$4 sm:$0xff]   ;;  %v646_v57 = vxor.u32 %v644_v55, %v642_v53  ;;  %v645_v58 = vxor.u32 %v643_v56, %v641_v54 }
  0xb5   :  { %v1152_v53 = vadd.s32 397355436, %v2085_v41  ;;  %v1151_v54 = vadd.s32 397355436, %v2087_v42 }
  0xb6   :  { %vm389_vm0 = vcmp.ge.s32.totalorder %v387_v61, 214748365  ;;  %vm388_vm1 = vcmp.ge.s32.totalorder %v386_v62, 214748365  ;;  %v648_v59 = vshrl.u32 %v646_v57, 1  ;;  %v647_v60 = vshrl.u32 %v645_v58, 1 }
  0xb7   :  { %852 = vmatpush1.bf16.msra.mxu0 %v1671_v8  ;;  %vm1430_vm2 = vmpackc.low %vm389_vm0, %vm389_vm0  ;;  %v1710_v8 = vld [vmem:[#allocation9 + $0xf0] ss:$8 sps:$4 sm:$0xff]   ;;  %v1154_v55 = vshrl.u32 %v1152_v53, 16  ;;  %v1153_v56 = vshrl.u32 %v1151_v54, 16 }
  0xb8   :  { %853 = vmatprep.subr.bf16.mxu0 %v1676_v9  ;;  %vm1433_vm3 = vmpackc.low %vm388_vm1, %vm388_vm1  ;;  %v1713_v9 = vld [vmem:[#allocation11] ss:$8 sps:$4 sm:$0xff]   ;;  %vm650_vm4 = vcmp.ge.s32.totalorder %v648_v59, 214748365  ;;  %vm649_vm5 = vcmp.ge.s32.totalorder %v647_v60, 214748365 }
  0xb9   :  { %vm1468_vm6 = vmpackc.low %vm650_vm4, %vm650_vm4  ;;  %v1156_v57 = vxor.u32 %v1154_v55, %v1152_v53  ;;  %v1155_v58 = vxor.u32 %v1153_v56, %v1151_v54 }
  0xba   :  { %vm1471_vm7 = vmpackc.low %vm649_vm5, %vm649_vm5 }
  0xbb   :  { %854 = vmatpush1.bf16.msra.mxu0 %v1674_v10  ;;  %v1715_v10 = vld [vmem:[#allocation11 + $0x4] ss:$8 sps:$4 sm:$0xff]   ;;  %v1158_v59 = vmul.u32 2146121005, %v1156_v57  ;;  %v1157_v60 = vmul.u32 2146121005, %v1155_v58 }
  0xbc   :  { %855 = vmatprep.subr.bf16.mxu0 %v1679_v11  ;;  %v1718_v11 = vld [vmem:[#allocation11 + $0x14] ss:$8 sps:$4 sm:$0xff]   ;;  %1108 = vmatprep.subr.bf16.mxu1 %v1715_v10  ;;  %v1764_v10 = vld [vmem:[#allocation12 + $0x8] sm:$0xff]  }
  0xbf   :  { %856 = vmatpush1.bf16.msra.mxu0 %v1677_v12  ;;  %v1716_v12 = vld [vmem:[#allocation11 + $0x10] ss:$8 sps:$4 sm:$0xff]  }
  0xc0   :  { %857 = vmatprep.subr.bf16.mxu0 %v1682_v13  ;;  %v1721_v13 = vld [vmem:[#allocation11 + $0x24] ss:$8 sps:$4 sm:$0xff]  }
  0xc3   :  { %858 = vmatpush1.bf16.msra.mxu0 %v1680_v14  ;;  %v1719_v14 = vld [vmem:[#allocation11 + $0x20] ss:$8 sps:$4 sm:$0xff]  }
  0xc4   :  { %859 = vmatprep.subr.bf16.mxu0 %v1685_v15  ;;  %v1724_v15 = vld [vmem:[#allocation11 + $0x34] ss:$8 sps:$4 sm:$0xff]  }
  0xc7   :  { %860 = vmatpush1.bf16.msra.mxu0 %v1683_v16  ;;  %v1722_v16 = vld [vmem:[#allocation11 + $0x30] ss:$8 sps:$4 sm:$0xff]  }
  0xc8   :  { %861 = vmatprep.subr.bf16.mxu0 %v1688_v17  ;;  %v1727_v17 = vld [vmem:[#allocation11 + $0x44] ss:$8 sps:$4 sm:$0xff]  }
  0xcb   :  { %862 = vmatpush1.bf16.msra.mxu0 %v1686_v18  ;;  %v1725_v18 = vld [vmem:[#allocation11 + $0x40] ss:$8 sps:$4 sm:$0xff]  }
  0xcc   :  { %863 = vmatprep.subr.bf16.mxu0 %v1691_v19  ;;  %v1730_v19 = vld [vmem:[#allocation11 + $0x54] ss:$8 sps:$4 sm:$0xff]  }
  0xcf   :  { %864 = vmatpush1.bf16.msra.mxu0 %v1689_v20  ;;  %v1728_v20 = vld [vmem:[#allocation11 + $0x50] ss:$8 sps:$4 sm:$0xff]  }
  0xd0   :  { %865 = vmatprep.subr.bf16.mxu0 %v1694_v21  ;;  %v1733_v21 = vld [vmem:[#allocation11 + $0x64] ss:$8 sps:$4 sm:$0xff]  }
  0xd3   :  { %866 = vmatpush1.bf16.msra.mxu0 %v1692_v22  ;;  %v1731_v22 = vld [vmem:[#allocation11 + $0x60] ss:$8 sps:$4 sm:$0xff]  }
  0xd4   :  { %867 = vmatprep.subr.bf16.mxu0 %v1697_v23  ;;  %v1736_v23 = vld [vmem:[#allocation11 + $0x74] ss:$8 sps:$4 sm:$0xff]  }
  0xd7   :  { %868 = vmatpush1.bf16.msra.mxu0 %v1695_v24  ;;  %v1734_v24 = vld [vmem:[#allocation11 + $0x70] ss:$8 sps:$4 sm:$0xff]  }
  0xd8   :  { %869 = vmatprep.subr.bf16.mxu0 %v1700_v25  ;;  %v1739_v25 = vld [vmem:[#allocation11 + $0x84] ss:$8 sps:$4 sm:$0xff]  }
  0xdb   :  { %870 = vmatpush1.bf16.msra.mxu0 %v1698_v26  ;;  %v1737_v26 = vld [vmem:[#allocation11 + $0x80] ss:$8 sps:$4 sm:$0xff]  }
  0xdc   :  { %871 = vmatprep.subr.bf16.mxu0 %v1703_v27  ;;  %v1742_v27 = vld [vmem:[#allocation11 + $0x94] ss:$8 sps:$4 sm:$0xff]  }
  0xdf   :  { %872 = vmatpush1.bf16.msra.mxu0 %v1701_v28  ;;  %v1740_v28 = vld [vmem:[#allocation11 + $0x90] ss:$8 sps:$4 sm:$0xff]  }
  0xe0   :  { %873 = vmatprep.subr.bf16.mxu0 %v1706_v29  ;;  %v1745_v29 = vld [vmem:[#allocation11 + $0xa4] ss:$8 sps:$4 sm:$0xff]  }
  0xe3   :  { %874 = vmatpush1.bf16.msra.mxu0 %v1704_v30  ;;  %v1743_v30 = vld [vmem:[#allocation11 + $0xa0] ss:$8 sps:$4 sm:$0xff]  }
  0xe4   :  { %875 = vmatprep.subr.bf16.mxu0 %v1709_v31  ;;  %v1748_v31 = vld [vmem:[#allocation11 + $0xb4] ss:$8 sps:$4 sm:$0xff]  }
  0xe7   :  { %876 = vmatpush1.bf16.msra.mxu0 %v1707_v32  ;;  %v1746_v32 = vld [vmem:[#allocation11 + $0xb0] ss:$8 sps:$4 sm:$0xff]  }
  0xe8   :  { %877 = vmatprep.subr.bf16.mxu0 %v1712_v7  ;;  %v1761_v7 = vld [vmem:[#allocation12 + $0x40] sm:$0xff]  }
  0xeb   :  { %878 = vmatpush1.bf16.msra.mxu0 %v1710_v8  ;;  %v1762_v8 = vld [vmem:[#allocation12] sm:$0xff]  }
  0xec   :  { %1534 = vmatprep.subr.bf16.mxu0 %v1761_v7 }
 0x181   :  { %v345_v63 = vpop.f32.mrb[0].mxu0 }
 0x182   :  { %v352_v0 = vmax.f32 %v345_v63, 0.0  ;;  %v347_v1 = vpop.f32.mrb[1].mxu0 }
 0x183   :  { %v353_v2 = vmax.f32 %v347_v1, 0.0  ;;  %v349_v3 = vpop.f32.mrb[2].mxu0 }
 0x184   :  { %v350_v4 = vpop.f32.mrb[3].mxu0  ;;  %v1434_v6 = vpack.c.bf16 %v352_v0, %v352_v0 }
 0x185   :  { %v1431_v5 = vpack.c.bf16 %v353_v2, %v353_v2 }
 0x187   :  { %1432 = vmatprep.mubr.msk.bf16.mxu1 %vm1430_vm2, %v1431_v5  ;;  %v1760_v5 = vld [vmem:[#allocation11 + $0xf4] ss:$8 sps:$4 sm:$0xff]  }
 0x188   :  { %1435 = vmatmul.mubr.msk.bf16.vlgmr.msra.gmra.mrb[0].mxu1 %vm1433_vm3, %v1434_v6  ;;  %v1758_v6 = vld [vmem:[#allocation11 + $0xf0] ss:$8 sps:$4 sm:$0xff]  }
 0x189   :  { %1109 = vmatpush1.bf16.msra.mxu1 %v1713_v9  ;;  %v1763_v9 = vld [vmem:[#allocation12 + $0x48] sm:$0xff]  }
 0x18a   :  { %1110 = vmatprep.subr.bf16.mxu1 %v1718_v11  ;;  %v1765_v11 = vld [vmem:[#allocation12 + $0x50] sm:$0xff]  }
 0x18d   :  { %1111 = vmatpush1.bf16.msra.mxu1 %v1716_v12  ;;  %v1766_v12 = vld [vmem:[#allocation12 + $0x10] sm:$0xff]  }
 0x18e   :  { %1112 = vmatprep.subr.bf16.mxu1 %v1721_v13  ;;  %v1767_v13 = vld [vmem:[#allocation12 + $0x58] sm:$0xff]  }
 0x191   :  { %1113 = vmatpush1.bf16.msra.mxu1 %v1719_v14  ;;  %v1768_v14 = vld [vmem:[#allocation12 + $0x18] sm:$0xff]  }
 0x192   :  { %1114 = vmatprep.subr.bf16.mxu1 %v1724_v15  ;;  %v1769_v15 = vld [vmem:[#allocation12 + $0x60] sm:$0xff]  }
 0x195   :  { %1115 = vmatpush1.bf16.msra.mxu1 %v1722_v16  ;;  %v1770_v16 = vld [vmem:[#allocation12 + $0x20] sm:$0xff]  }
 0x196   :  { %1116 = vmatprep.subr.bf16.mxu1 %v1727_v17  ;;  %v1771_v17 = vld [vmem:[#allocation12 + $0x68] sm:$0xff]  }
 0x199   :  { %1117 = vmatpush1.bf16.msra.mxu1 %v1725_v18  ;;  %v1772_v18 = vld [vmem:[#allocation12 + $0x28] sm:$0xff]  }
 0x19a   :  { %1118 = vmatprep.subr.bf16.mxu1 %v1730_v19  ;;  %v1773_v19 = vld [vmem:[#allocation12 + $0x70] sm:$0xff]  }
 0x19d   :  { %1119 = vmatpush1.bf16.msra.mxu1 %v1728_v20  ;;  %v891_v20 = vadd.s32 2445500225, %v2085_v41 }
 0x19e   :  { %1120 = vmatprep.subr.bf16.mxu1 %v1733_v21  ;;  %v890_v21 = vadd.s32 2445500225, %v2087_v42 }
 0x1a1   :  { %1121 = vmatpush1.bf16.msra.mxu1 %v1731_v22  ;;  %v893_v22 = vshrl.u32 %v891_v20, 16 }
 0x1a2   :  { %1122 = vmatprep.subr.bf16.mxu1 %v1736_v23  ;;  %v892_v23 = vshrl.u32 %v890_v21, 16 }
 0x1a5   :  { %1123 = vmatpush1.bf16.msra.mxu1 %v1734_v24  ;;  %v895_v24 = vxor.u32 %v893_v22, %v891_v20 }
 0x1a6   :  { %1124 = vmatprep.subr.bf16.mxu1 %v1739_v25  ;;  %v894_v25 = vxor.u32 %v892_v23, %v890_v21 }
 0x1a9   :  { %1125 = vmatpush1.bf16.msra.mxu1 %v1737_v26  ;;  %v897_v26 = vmul.u32 2146121005, %v895_v24 }
 0x1aa   :  { %1126 = vmatprep.subr.bf16.mxu1 %v1742_v27  ;;  %v896_v27 = vmul.u32 2146121005, %v894_v25 }
 0x1ad   :  { %1127 = vmatpush1.bf16.msra.mxu1 %v1740_v28  ;;  %v899_v28 = vshrl.u32 %v897_v26, 15 }
 0x1ae   :  { %1128 = vmatprep.subr.bf16.mxu1 %v1745_v29  ;;  %v898_v29 = vshrl.u32 %v896_v27, 15 }
 0x1b1   :  { %1129 = vmatpush1.bf16.msra.mxu1 %v1743_v30  ;;  %v901_v30 = vxor.u32 %v899_v28, %v897_v26 }
 0x1b2   :  { %1130 = vmatprep.subr.bf16.mxu1 %v1748_v31  ;;  %v900_v31 = vxor.u32 %v898_v29, %v896_v27 }
 0x1b5   :  { %1131 = vmatpush1.bf16.msra.mxu1 %v1746_v32  ;;  %v903_v32 = vmul.u32 2221713035, %v901_v30 }
 0x1b6   :  { %1132 = vmatprep.subr.bf16.mxu1 %v1751_v33  ;;  %v902_v33 = vmul.u32 2221713035, %v900_v31 }
 0x1b9   :  { %1133 = vmatpush1.bf16.msra.mxu1 %v1749_v34  ;;  %v905_v34 = vshrl.u32 %v903_v32, 16 }
 0x1ba   :  { %1134 = vmatprep.subr.bf16.mxu1 %v1754_v35  ;;  %v904_v35 = vshrl.u32 %v902_v33, 16 }
 0x1bd   :  { %1135 = vmatpush1.bf16.msra.mxu1 %v1752_v36  ;;  %v907_v36 = vxor.u32 %v905_v34, %v903_v32 }
 0x1be   :  { %1136 = vmatprep.subr.bf16.mxu1 %v1757_v37  ;;  %v906_v37 = vxor.u32 %v904_v35, %v902_v33 }
 0x1c0   :  { %v908_v39 = vshrl.u32 %v906_v37, 1 }
 0x1c1   :  { %1137 = vmatpush1.bf16.msra.mxu1 %v1755_v38  ;;  %v909_v38 = vshrl.u32 %v907_v36, 1 }
 0x1c2   :  { %1138 = vmatprep.subr.bf16.mxu1 %v1760_v5  ;;  %vm910_vm9 = vcmp.ge.s32.totalorder %v908_v39, 214748365 }
 0x1c3   :  { %vm911_vm8 = vcmp.ge.s32.totalorder %v909_v38, 214748365  ;;  %vm1509_vm11 = vmpackc.low %vm910_vm9, %vm910_vm9 }
 0x1c4   :  { %vm1506_vm10 = vmpackc.low %vm911_vm8, %vm911_vm8 }
 0x1c5   :  { %1139 = vmatpush1.bf16.msra.mxu1 %v1758_v6 }
 0x25b   :  { %v620_v61 = vpop.f32.mrb[0].mxu1 }
 0x25c   :  { %v627_v62 = vmax.f32 %v620_v61, 0.0  ;;  %v622_v63 = vpop.f32.mrb[1].mxu1  ;;  %v1160_v61 = vshrl.u32 %v1158_v59, 15 }
 0x25d   :  { %v628_v0 = vmax.f32 %v622_v63, 0.0  ;;  %v624_v1 = vpop.f32.mrb[2].mxu1 }
 0x25e   :  { %v625_v2 = vpop.f32.mrb[3].mxu1  ;;  %v1472_v4 = vpack.c.bf16 %v627_v62, %v627_v62  ;;  %v1159_v62 = vshrl.u32 %v1157_v60, 15  ;;  %v1162_v63 = vxor.u32 %v1160_v61, %v1158_v59 }
 0x25f   :  { %v1469_v3 = vpack.c.bf16 %v628_v0, %v628_v0 }
 0x260   :  { %v1161_v0 = vxor.u32 %v1159_v62, %v1157_v60  ;;  %v1164_v1 = vmul.u32 2221713035, %v1162_v63 }
 0x261   :  { %1470 = vmatprep.mubr.msk.bf16.mxu0 %vm1468_vm6, %v1469_v3 }
 0x262   :  { %1473 = vmatmul.mubr.msk.bf16.vlgmr.msra.gmra.mrb[4].mxu0 %vm1471_vm7, %v1472_v4  ;;  %v1163_v2 = vmul.u32 2221713035, %v1161_v0  ;;  %v1166_v3 = vshrl.u32 %v1164_v1, 16 }
 0x263   :  { %1535 = vmatpush3.bf16.msra.mxu0 %v1762_v8 }
 0x264   :  { %1536 = vmatprep.subr.bf16.mxu0 %v1763_v9  ;;  %v1165_v4 = vshrl.u32 %v1163_v2, 16  ;;  %v1168_v5 = vxor.u32 %v1166_v3, %v1164_v1 }
 0x266   :  { %v1167_v6 = vxor.u32 %v1165_v4, %v1163_v2  ;;  %v1170_v7 = vshrl.u32 %v1168_v5, 1 }
 0x267   :  { %1537 = vmatpush3.bf16.msra.mxu0 %v1764_v10 }
 0x268   :  { %1538 = vmatprep.subr.bf16.mxu0 %v1765_v11  ;;  %v1169_v41 = vshrl.u32 %v1167_v6, 1  ;;  %vm1172_vm12 = vcmp.ge.s32.totalorder %v1170_v7, 214748365 }
 0x269   :  { %vm1528_vm14 = vmpackc.low %vm1172_vm12, %vm1172_vm12 }
 0x26a   :  { %vm1171_vm13 = vcmp.ge.s32.totalorder %v1169_v41, 214748365 }
 0x26b   :  { %1539 = vmatpush3.bf16.msra.mxu0 %v1766_v12  ;;  %vm1531_vm15 = vmpackc.low %vm1171_vm13, %vm1171_vm13 }
 0x26c   :  { %1540 = vmatprep.subr.bf16.mxu0 %v1767_v13 }
 0x26f   :  { %1541 = vmatpush3.bf16.msra.mxu0 %v1768_v14 }
 0x270   :  { %1542 = vmatprep.subr.bf16.mxu0 %v1769_v15 }
 0x273   :  { %1543 = vmatpush3.bf16.msra.mxu0 %v1770_v16 }
 0x274   :  { %1544 = vmatprep.subr.bf16.mxu0 %v1771_v17 }
 0x277   :  { %1545 = vmatpush3.bf16.msra.mxu0 %v1772_v18 }
 0x278   :  { %1546 = vmatprep.subr.bf16.mxu0 %v1773_v19 }
 0x27b   :  { %1547 = vmatpush3.bf16.msra.mxu0 %v1774_v50 }
 0x27c   :  { %1548 = vmatprep.subr.bf16.mxu0 %v1775_v51 }
 0x27f   :  { %1549 = vmatpush3.bf16.msra.mxu0 %v1776_v52 }
 0x335   :  { %v881_v40 = vpop.f32.mrb[4].mxu0 }
 0x336   :  { %v888_v43 = vmax.f32 %v881_v40, 0.0  ;;  %v883_v44 = vpop.f32.mrb[5].mxu0 }
 0x337   :  { %v889_v45 = vmax.f32 %v883_v44, 0.0  ;;  %v885_v46 = vpop.f32.mrb[6].mxu0 }
 0x338   :  { %v886_v47 = vpop.f32.mrb[7].mxu0  ;;  %v1510_v49 = vpack.c.bf16 %v888_v43, %v888_v43 }
 0x339   :  { %v1507_v48 = vpack.c.bf16 %v889_v45, %v889_v45 }
 0x33b   :  { %1508 = vmatprep.mubr.msk.bf16.mxu1 %vm1506_vm10, %v1507_v48 }
 0x33c   :  { %1511 = vmatmul.mubr.msk.bf16.vlgmr.msra.gmra.mrb[4].mxu1 %vm1509_vm11, %v1510_v49 }
 0x40f   :  { %v1142_v8 = vpop.f32.mrb[4].mxu1 }
 0x410   :  { %v1149_v42 = vmax.f32 %v1142_v8, 0.0  ;;  %v1144_v9 = vpop.f32.mrb[5].mxu1 }
 0x411   :  { %v1150_v10 = vmax.f32 %v1144_v9, 0.0  ;;  %v1146_v11 = vpop.f32.mrb[6].mxu1 }
 0x412   :  { %v1147_v12 = vpop.f32.mrb[7].mxu1  ;;  %v1532_v14 = vpack.c.bf16 %v1149_v42, %v1149_v42 }
 0x413   :  { %v1529_v13 = vpack.c.bf16 %v1150_v10, %v1150_v10 }
 0x415   :  { %1530 = vmatprep.mubr.msk.bf16.mxu0 %vm1528_vm14, %v1529_v13 }
 0x416   :  { %1533 = vmatmul.mubr.msk.bf16.vlgmr.msra.gmra.mrb[8].mxu0 %vm1531_vm15, %v1532_v14 }
 0x4e9   :  { %v1550_v15 = vpop.f32.mrb[8].mxu0 }
 0x4ea   :  { %v1551_v16 = vpop.f32.mrb[9].mxu0 }
 0x4eb   :  { %v1552_v17 = vadd.f32 %v1551_v16, %v1550_v15  ;;  %v1553_v18 = vpop.f32.mrb[10].mxu0 }
 0x4ec   :  { %v1554_v19 = vpop.f32.mrb[11].mxu0 }
 0x4ed   :  { %1345 = vst [vmem:[#allocation14] sm:$0xff] %v1552_v17 }
 0x4ee   :  { %1920 = shalt.err (!%p1917_p10)
}
 0x4ef   :  { %s1921_s30 = scalar_lea.hbm %s2116_s7, 128 }
 0x4f0   :  { %p1922_p11 = scmp.ne.s32.totalorder %s2116_s7, %s1921_s30  ;;  %p1925_p12 = scmp.lt.u32.totalorder %s1921_s30, %s2116_s7 }
 0x4f2   :  { %p1927_p13 = pnand %p1925_p12, %p1922_p11 }
 0x4f4   :  { %1930 = shalt.err (!%p1927_p13)
}
 0x4f5   :  { %1355 = dma.vmem_to_hbm [thread:$0]  %s1353_s18, 128, %s2116_s7, [#allocation5]  }
 0x4f6   :  { %1939 = dma.done.wait [#allocation5], 128  }
 0x4f7   :  { %1940 = vsyncadd [#allocation5], 4294967168 }
 0x4f8   :  { %1359 = vsyncpa [#allocation4], 1 }
 0x4f9   :  { %1360 = vsyncpa [#allocation7], 1 }
 0x4fa   :  { %1361 = vsyncpa [#allocation10], 1 }
 0x4fb   :  { %1362 = vsyncpa [#allocation13], 1 }
 0x4fc   :  { %1363 = vsyncpa [#allocation5], 1 }

</bundles_post_ra>
